<compile_context>
chip_gen: v7x
topology: tpu7x:2x2x1
jax: 0.10.0
libtpu: 0.0.40
codegen_flags: <defaults>
</compile_context>

<pallas_src>
import jax
import jax.numpy as jnp
import numpy as np
from jax import lax
from jax.experimental import pallas as pl
from jax.experimental.pallas import tpu as pltpu


def _round_up(x, m):
    return ((x + m - 1) // m) * m


# ----------------------------------------------------------------------------
# Fused Pallas kernel (factory closing over static dims)
# ----------------------------------------------------------------------------

def _make_xgnn_kernel(*, n_valid, n_data, n_pad, f_pad, d1, d2, dm1, dm2):
    # static row offsets inside the packed weight buffer
    r_w1 = 0
    r_w2 = r_w1 + d1
    r_m10 = r_w2 + d2
    r_m20a = r_m10 + dm1
    r_m20b = r_m20a + dm2

    def kernel(a_ref, x_ref, w_ref, b_ref,
               out1_ref, out2_ref, sidx_ref, eidx_ref, newfeat_ref):
        f32 = jnp.float32
        a_t = a_ref[...]          # (n_pad, n_pad) padded normalized A^T
        x_t = x_ref[...]          # (f_pad, n_pad) padded feature-major X^T
        wbuf = w_ref[...]         # packed weights
        bbuf = b_ref[...]         # packed biases / thin vectors

        # ---- static carve-outs of the packed parameter buffers -------------
        w1 = wbuf[r_w1:r_w1 + d1, 0:f_pad]
        w2 = wbuf[r_w2:r_w2 + d2, 0:d1]
        m10w = wbuf[r_m10:r_m10 + dm1, 0:d2]
        m20a = wbuf[r_m20a:r_m20a + dm2, 0:d2]
        m20b = wbuf[r_m20b:r_m20b + dm2, 0:d2]

        b1 = bbuf[0:d1, 0:1]
        b2 = bbuf[0:d2, 1:2]
        m10b = bbuf[0:dm1, 2:3]
        m11w = bbuf[0:dm1, 3:4]
        m20bias = bbuf[0:dm2, 4:5]
        m21w = bbuf[0:dm2, 5:6]
        m11b = bbuf[0:1, 6:7]
        m21b = bbuf[1:2, 6:7]

        # ---- GCN stack, transposed form:  H'.T = relu( W (H.T A.T) + b ) ---
        def gcn_layer(h, w, b):
            in_dim, out_dim = w.shape[1], w.shape[0]
            if out_dim < in_dim:      # project first -> smaller N^2 FLOP term
                z = jnp.dot(w, h, preferred_element_type=f32)
                z = jnp.dot(z, a_t, preferred_element_type=f32)
            else:                     # aggregate first
                z = jnp.dot(h, a_t, preferred_element_type=f32)
                z = jnp.dot(w, z, preferred_element_type=f32)
            return jnp.maximum(z + b, 0.0)

        h = gcn_layer(x_t, w1, b1)               # (d1, n_pad)
        node_feat = gcn_layer(h, w2, b2)         # (d2, n_pad)

        # ---- first MLP -> out1 (lane-dense (1, n_pad) logits) --------------
        y = jnp.dot(m10w, node_feat, preferred_element_type=f32)
        y = jnp.maximum(y + m10b, 0.0)                                   # (dm1, n_pad)
        out1 = jnp.sum(y * m11w, axis=0, keepdims=True) + m11b          # (1, n_pad)
        out1_ref[...] = out1

        lanes = lax.broadcasted_iota(jnp.int32, (1, n_pad), 1)
        valid = lanes < n_valid
        neg = jnp.float32(-1e30)

        def masked_argmax(logits, mask_bool):
            # softmax is monotonic: argmax(softmax(l)*mask) == argmax of
            # masked logits; first occurrence on ties (matches torch.argmax).
            ml = jnp.where(mask_bool, logits, neg)
            best = jnp.max(ml)
            return jnp.min(jnp.where(ml == best, lanes, jnp.int32(n_pad)))

        start_idx = masked_argmax(out1, lanes < n_data)
        sidx_ref[0, 0] = start_idx

        # ---- fused hstack for MLP2: gather starting column via one-hot -----
        onehot_start = (lanes == start_idx).astype(f32)                        # (1, n_pad)
        start_feat = jnp.sum(node_feat * onehot_start, axis=1, keepdims=True)  # (d2, 1)

        y2 = (jnp.dot(m20a, node_feat, preferred_element_type=f32)
              + jnp.dot(m20b, start_feat, preferred_element_type=f32)          # bcast col
              + m20bias)
        y2 = jnp.maximum(y2, 0.0)                                              # (dm2, n_pad)
        out2 = jnp.sum(y2 * m21w, axis=0, keepdims=True) + m21b                # (1, n_pad)
        out2_ref[...] = out2

        # ---- second selection: valid lanes, excluding the starting node ----
        end_idx = masked_argmax(out2, valid & (lanes != start_idx))
        eidx_ref[0, 0] = end_idx

        # ---- candidate new_features = first_x[ending_idx] as a lane row ----
        onehot_end = (lanes == end_idx).astype(f32)                            # (1, n_pad)
        newfeat_ref[...] = lax.dot_general(
            onehot_end, x_t, (((1,), (1,)), ((), ())),
            preferred_element_type=f32)                                        # (1, f_pad)

    return kernel


# ----------------------------------------------------------------------------
# Glue (plain JAX): params, packing, jitted forward wrapper
# ----------------------------------------------------------------------------

def init_params(key, in_dim, gcn_latent_dim=(16, 16), starting_mlp=16, ending_mlp=24):
    # Weights stored in PyTorch (out_features, in_features) layout.
    def glorot(k, fan_out, fan_in):
        scale = jnp.sqrt(6.0 / (fan_in + fan_out))
        return jax.random.uniform(k, (fan_out, fan_in), jnp.float32, -scale, scale)

    keys = jax.random.split(key, 6)
    d1, d2 = gcn_latent_dim
    return {
        "conv1_w": glorot(keys[0], d1, in_dim), "conv1_b": jnp.zeros((d1,), jnp.float32),
        "conv2_w": glorot(keys[1], d2, d1),     "conv2_b": jnp.zeros((d2,), jnp.float32),
        "mlp1_0_w": glorot(keys[2], starting_mlp, d2),
        "mlp1_0_b": jnp.zeros((starting_mlp,), jnp.float32),
        "mlp1_1_w": glorot(keys[3], 1, starting_mlp),
        "mlp1_1_b": jnp.zeros((1,), jnp.float32),
        "mlp2_0_w": glorot(keys[4], ending_mlp, 2 * d2),
        "mlp2_0_b": jnp.zeros((ending_mlp,), jnp.float32),
        "mlp2_1_w": glorot(keys[5], 1, ending_mlp),
        "mlp2_1_b": jnp.zeros((1,), jnp.float32),
    }


@jax.jit
def xgnn_forward(params, data_x, candidates, edge_index):
    f32 = jnp.float32
    n_data, f_in = data_x.shape
    n_cand = candidates.shape[0]
    n = n_data + n_cand

    d1 = params["conv1_w"].shape[0]
    d2 = params["conv2_w"].shape[0]
    dm1 = params["mlp1_0_w"].shape[0]
    dm2 = params["mlp2_0_w"].shape[0]

    # nodes on the lane axis, padded to a full 128-lane vreg
    n_pad = _round_up(max(n, 128), 128)
    # shared column width of the weight slab == padded feature-row count of X^T
    f_pad = _round_up(max(f_in, d1, d2), 8)

    x = jnp.concatenate([data_x, candidates], axis=0).astype(f32)        # (n, f_in)

    # normalized adjacency built directly in transposed form (no extra .T op)
    src = edge_index[0]
    dst = edge_index[1]
    a_t = jnp.zeros((n, n), f32).at[src, dst].add(1.0) + jnp.eye(n, dtype=f32)
    deg = jnp.sum(a_t, axis=0)                      # original row degrees (A + I)
    d_is = lax.rsqrt(deg)
    a_t = a_t * d_is[:, None] * d_is[None, :]       # == (D^-1/2 (A+I) D^-1/2)^T

    a_pad = jnp.zeros((n_pad, n_pad), f32).at[:n, :n].set(a_t)
    x_pad = jnp.zeros((f_pad, n_pad), f32).at[:f_in, :n].set(x.T)

    # ---- pack the 13 small parameter tensors into two VMEM buffers ---------
    def pad_cols(w):
        return jnp.zeros((w.shape[0], f_pad), f32).at[:, :w.shape[1]].set(w)

    m20w = params["mlp2_0_w"]
    wbuf = jnp.concatenate([
        pad_cols(params["conv1_w"]),          # rows [0, d1)
        pad_cols(params["conv2_w"]),          # rows [d1, d1+d2)
        pad_cols(params["mlp1_0_w"]),         # rows [.., +dm1)
        pad_cols(m20w[:, :d2]),               # MLP2 W, node-feature half
        pad_cols(m20w[:, d2:]),               # MLP2 W, broadcast starting-feat half
    ], axis=0)
    wrows = _round_up(wbuf.shape[0], 8)
    wbuf = jnp.zeros((wrows, f_pad), f32).at[:wbuf.shape[0], :].set(wbuf)

    rb = _round_up(max(d1, d2, dm1, dm2, 2), 8)

    def col(v):
        v = jnp.asarray(v, f32).reshape(-1)
        return jnp.zeros((rb, 1), f32).at[:v.shape[0], 0].set(v)

    bbuf = jnp.concatenate([
        col(params["conv1_b"]),                                           # col 0
        col(params["conv2_b"]),                                           # col 1
        col(params["mlp1_0_b"]),                                          # col 2
        col(params["mlp1_1_w"]),                                          # col 3
        col(params["mlp2_0_b"]),                                          # col 4
        col(params["mlp2_1_w"]),                                          # col 5
        col(jnp.stack([params["mlp1_1_b"][0], params["mlp2_1_b"][0]])),   # col 6
        jnp.zeros((rb, 1), f32),                                          # col 7 (pad)
    ], axis=1)                                                            # (rb, 8)

    kernel = _make_xgnn_kernel(n_valid=n, n_data=n_data, n_pad=n_pad, f_pad=f_pad,
                               d1=d1, d2=d2, dm1=dm1, dm2=dm2)

    vmem = pltpu.MemorySpace.VMEM
    smem = pltpu.MemorySpace.SMEM

    flops = (2 * n_pad * n_pad * (f_pad + d1)
             + 2 * n_pad * (d1 * f_pad + d2 * d1 + dm1 * d2 + dm2 * d2)
             + 2 * dm2 * d2)
    bytes_accessed = 4 * (a_pad.size + x_pad.size + wbuf.size + bbuf.size
                          + 2 * n_pad + f_pad) + 8

    out1_row, out2_row, sidx, eidx, newfeat = pl.pallas_call(
        kernel,
        out_shape=(
            jax.ShapeDtypeStruct((1, n_pad), f32),    # out1 (lane-dense row)
            jax.ShapeDtypeStruct((1, n_pad), f32),    # out2 (lane-dense row)
            jax.ShapeDtypeStruct((1, 1), jnp.int32),  # starting_idx
            jax.ShapeDtypeStruct((1, 1), jnp.int32),  # ending_idx
            jax.ShapeDtypeStruct((1, f_pad), f32),    # first_x[ending_idx]
        ),
        in_specs=[pl.BlockSpec(memory_space=vmem)] * 4,
        out_specs=(
            pl.BlockSpec(memory_space=vmem),
            pl.BlockSpec(memory_space=vmem),
            pl.BlockSpec(memory_space=smem),
            pl.BlockSpec(memory_space=smem),
            pl.BlockSpec(memory_space=vmem),
        ),
        cost_estimate=pl.CostEstimate(flops=int(flops), transcendentals=0,
                                      bytes_accessed=int(bytes_accessed)),
    )(a_pad, x_pad, wbuf, bbuf)

    starting_idx = sidx[0, 0]
    ending_idx = eidx[0, 0]
    out1 = out1_row[:, :n].reshape(n, 1)
    out2 = out2_row[:, :n].reshape(n, 1)
    new_features_candidate = newfeat[0, :f_in]
    is_new_node = ending_idx >= n_data        # stays on device; no mid-forward sync
    return starting_idx, ending_idx, is_new_node, new_features_candidate, out1, out2


# Pure-JAX reference, matching the PyTorch forward semantics exactly.
def xgnn_reference(params, data_x, candidates, edge_index):
    x = jnp.concatenate([data_x, candidates], axis=0).astype(jnp.float32)
    n = x.shape[0]
    n_data = data_x.shape[0]
    src, dst = edge_index[0], edge_index[1]
    a = jnp.zeros((n, n), jnp.float32).at[dst, src].add(1.0) + jnp.eye(n, dtype=jnp.float32)
    deg = jnp.sum(a, axis=1)
    dis = jax.lax.rsqrt(deg)
    a = a * dis[:, None] * dis[None, :]
    h = x
    for w, b in ((params["conv1_w"], params["conv1_b"]),
                 (params["conv2_w"], params["conv2_b"])):
        h = jnp.maximum(a @ (h @ w.T) + b, 0.0)
    node_feat = h
    y = jnp.maximum(h @ params["mlp1_0_w"].T + params["mlp1_0_b"], 0.0)
    out1 = y @ params["mlp1_1_w"].T + params["mlp1_1_b"]
    smask = jnp.concatenate([jnp.ones((n_data, 1)), jnp.zeros((n - n_data, 1))], axis=0)
    sidx = jnp.argmax(jax.nn.softmax(out1, axis=0) * smask)
    sf = node_feat[sidx]
    nf2 = jnp.concatenate([node_feat, jnp.broadcast_to(sf[None, :], node_feat.shape)], axis=1)
    y2 = jnp.maximum(nf2 @ params["mlp2_0_w"].T + params["mlp2_0_b"], 0.0)
    out2 = y2 @ params["mlp2_1_w"].T + params["mlp2_1_b"]
    emask = jnp.ones((n, 1)).at[sidx, 0].set(0.0)
    eidx = jnp.argmax(jax.nn.softmax(out2, axis=0) * emask)
    return sidx, eidx, out1, out2, x[eidx]


# ----------------------------------------------------------------------------
# Main
# ----------------------------------------------------------------------------

if __name__ == "__main__":
    key = jax.random.PRNGKey(0)
    k_x, k_cand, k_params = jax.random.split(key, 3)

    n_data, n_cand, in_dim = 10, 6, 8
    data_x = jax.random.normal(k_x, (n_data, in_dim), jnp.float32)
    candidates = jax.random.normal(k_cand, (n_cand, in_dim), jnp.float32)

    # Small deterministic undirected ring over the data nodes (both directions).
    src = np.arange(n_data)
    dst = (src + 1) % n_data
    edge_index = jnp.asarray(
        np.stack([np.concatenate([src, dst]), np.concatenate([dst, src])], axis=0),
        dtype=jnp.int32,
    )

    params = init_params(k_params, in_dim)

    result = xgnn_forward(params, data_x, candidates, edge_index)
    result = jax.block_until_ready(result)
    starting_idx, ending_idx, is_new_node, new_feat_candidate, out1, out2 = result

    # Host-side interpretation AFTER the device program finished (matches the
    # PyTorch `if ending_idx >= data.x.shape[0]` branch without a mid-forward
    # device->host sync).
    if bool(is_new_node):
        adding_type = "new_node"
        new_features = new_feat_candidate
    else:
        adding_type = "old_node"
        new_features = None

    # Sanity check against a pure-JAX reference (tight tolerances: exact-math
    # f32 path, no approx reciprocal anymore).
    r_sidx, r_eidx, r_out1, r_out2, _ = xgnn_reference(params, data_x, candidates, edge_index)
    np.testing.assert_allclose(np.asarray(out1), np.asarray(r_out1), rtol=1e-4, atol=1e-4)
    np.testing.assert_allclose(np.asarray(out2), np.asarray(r_out2), rtol=1e-4, atol=1e-4)
    assert int(starting_idx) == int(r_sidx)
    assert int(ending_idx) == int(r_eidx)

    print("KERNEL_OK")
</pallas_src>

<mosaic_0001>
module attributes {stable_mosaic.version = 11 : i64} {
  func.func @kernel(%arg0: memref<128x128xf32, #tpu.memory_space<vmem>>, %arg1: memref<16x128xf32, #tpu.memory_space<vmem>>, %arg2: memref<96x16xf32, #tpu.memory_space<vmem>>, %arg3: memref<24x8xf32, #tpu.memory_space<vmem>>, %arg4: memref<1x128xf32, #tpu.memory_space<vmem>>, %arg5: memref<1x128xf32, #tpu.memory_space<vmem>>, %arg6: memref<1x1xi32, #tpu.memory_space<smem>>, %arg7: memref<1x1xi32, #tpu.memory_space<smem>>, %arg8: memref<1x16xf32, #tpu.memory_space<vmem>>) attributes {dimension_semantics = [], scalar_prefetch = 0 : i64, scratch_operands = 0 : i64, tpu.core_type = #tpu.core_type<tc>} {
    %c0 = arith.constant 0 : index
    %c0_0 = arith.constant 0 : index
    %0 = vector.load %arg0[%c0, %c0_0] : memref<128x128xf32, #tpu.memory_space<vmem>>, vector<128x128xf32>
    %c0_1 = arith.constant 0 : index
    %c0_2 = arith.constant 0 : index
    %1 = vector.load %arg1[%c0_1, %c0_2] : memref<16x128xf32, #tpu.memory_space<vmem>>, vector<16x128xf32>
    %c0_3 = arith.constant 0 : index
    %c0_4 = arith.constant 0 : index
    %2 = vector.load %arg2[%c0_3, %c0_4] : memref<96x16xf32, #tpu.memory_space<vmem>>, vector<96x16xf32>
    %c0_5 = arith.constant 0 : index
    %c0_6 = arith.constant 0 : index
    %3 = vector.load %arg3[%c0_5, %c0_6] : memref<24x8xf32, #tpu.memory_space<vmem>>, vector<24x8xf32>
    %4 = vector.extract_strided_slice %2 {offsets = [0, 0], sizes = [16, 16], strides = [1, 1]} : vector<96x16xf32> to vector<16x16xf32>
    %5 = vector.extract_strided_slice %2 {offsets = [16, 0], sizes = [16, 16], strides = [1, 1]} : vector<96x16xf32> to vector<16x16xf32>
    %6 = vector.extract_strided_slice %2 {offsets = [32, 0], sizes = [16, 16], strides = [1, 1]} : vector<96x16xf32> to vector<16x16xf32>
    %7 = vector.extract_strided_slice %2 {offsets = [48, 0], sizes = [24, 16], strides = [1, 1]} : vector<96x16xf32> to vector<24x16xf32>
    %8 = vector.extract_strided_slice %2 {offsets = [72, 0], sizes = [24, 16], strides = [1, 1]} : vector<96x16xf32> to vector<24x16xf32>
    %9 = vector.extract_strided_slice %3 {offsets = [0, 0], sizes = [16, 1], strides = [1, 1]} : vector<24x8xf32> to vector<16x1xf32>
    %10 = vector.extract_strided_slice %3 {offsets = [0, 1], sizes = [16, 1], strides = [1, 1]} : vector<24x8xf32> to vector<16x1xf32>
    %11 = vector.extract_strided_slice %3 {offsets = [0, 2], sizes = [16, 1], strides = [1, 1]} : vector<24x8xf32> to vector<16x1xf32>
    %12 = vector.extract_strided_slice %3 {offsets = [0, 3], sizes = [16, 1], strides = [1, 1]} : vector<24x8xf32> to vector<16x1xf32>
    %13 = vector.extract_strided_slice %3 {offsets = [0, 4], sizes = [24, 1], strides = [1, 1]} : vector<24x8xf32> to vector<24x1xf32>
    %14 = vector.extract_strided_slice %3 {offsets = [0, 5], sizes = [24, 1], strides = [1, 1]} : vector<24x8xf32> to vector<24x1xf32>
    %15 = vector.extract_strided_slice %3 {offsets = [0, 6], sizes = [1, 1], strides = [1, 1]} : vector<24x8xf32> to vector<1x1xf32>
    %16 = vector.extract_strided_slice %3 {offsets = [1, 6], sizes = [1, 1], strides = [1, 1]} : vector<24x8xf32> to vector<1x1xf32>
    %cst = arith.constant dense<0.000000e+00> : vector<16x128xf32>
    %17 = tpu.matmul %1, %0, %cst {dimension_numbers = #tpu.dot_dimension_numbers<[1], [0], [0], [1], [0, 0, 1, 1], [], []>} : vector<16x128xf32>, vector<128x128xf32>, vector<16x128xf32> -> vector<16x128xf32>
    %cst_7 = arith.constant dense<0.000000e+00> : vector<16x128xf32>
    %18 = tpu.matmul %4, %17, %cst_7 {dimension_numbers = #tpu.dot_dimension_numbers<[1], [0], [0], [1], [0, 0, 1, 1], [], []>} : vector<16x16xf32>, vector<16x128xf32>, vector<16x128xf32> -> vector<16x128xf32>
    %19 = vector.broadcast %9 : vector<16x1xf32> to vector<16x128xf32>
    %20 = arith.addf %18, %19 : vector<16x128xf32>
    %cst_8 = arith.constant 0.000000e+00 : f32
    %21 = vector.broadcast %cst_8 : f32 to vector<16x128xf32>
    %22 = arith.maximumf %20, %21 : vector<16x128xf32>
    %cst_9 = arith.constant dense<0.000000e+00> : vector<16x128xf32>
    %23 = tpu.matmul %22, %0, %cst_9 {dimension_numbers = #tpu.dot_dimension_numbers<[1], [0], [0], [1], [0, 0, 1, 1], [], []>} : vector<16x128xf32>, vector<128x128xf32>, vector<16x128xf32> -> vector<16x128xf32>
    %cst_10 = arith.constant dense<0.000000e+00> : vector<16x128xf32>
    %24 = tpu.matmul %5, %23, %cst_10 {dimension_numbers = #tpu.dot_dimension_numbers<[1], [0], [0], [1], [0, 0, 1, 1], [], []>} : vector<16x16xf32>, vector<16x128xf32>, vector<16x128xf32> -> vector<16x128xf32>
    %25 = vector.broadcast %10 : vector<16x1xf32> to vector<16x128xf32>
    %26 = arith.addf %24, %25 : vector<16x128xf32>
    %cst_11 = arith.constant 0.000000e+00 : f32
    %27 = vector.broadcast %cst_11 : f32 to vector<16x128xf32>
    %28 = arith.maximumf %26, %27 : vector<16x128xf32>
    %cst_12 = arith.constant dense<0.000000e+00> : vector<16x128xf32>
    %29 = tpu.matmul %6, %28, %cst_12 {dimension_numbers = #tpu.dot_dimension_numbers<[1], [0], [0], [1], [0, 0, 1, 1], [], []>} : vector<16x16xf32>, vector<16x128xf32>, vector<16x128xf32> -> vector<16x128xf32>
    %30 = vector.broadcast %11 : vector<16x1xf32> to vector<16x128xf32>
    %31 = arith.addf %29, %30 : vector<16x128xf32>
    %cst_13 = arith.constant 0.000000e+00 : f32
    %32 = vector.broadcast %cst_13 : f32 to vector<16x128xf32>
    %33 = arith.maximumf %31, %32 : vector<16x128xf32>
    %34 = vector.broadcast %12 : vector<16x1xf32> to vector<16x128xf32>
    %35 = arith.mulf %33, %34 : vector<16x128xf32>
    %cst_14 = arith.constant dense<0.000000e+00> : vector<128xf32>
    %36 = vector.multi_reduction <add>, %35, %cst_14 [0] : vector<16x128xf32> to vector<128xf32>
    %37 = vector.shape_cast %36 : vector<128xf32> to vector<1x128xf32>
    %38 = vector.broadcast %15 : vector<1x1xf32> to vector<1x128xf32>
    %39 = arith.addf %37, %38 : vector<1x128xf32>
    %c0_15 = arith.constant 0 : index
    %c0_16 = arith.constant 0 : index
    %40 = vector.load %arg4[%c0_15, %c0_16] : memref<1x128xf32, #tpu.memory_space<vmem>>, vector<1x128xf32>
    tpu.vector_store %arg4[%c0_15, %c0_16], %39 {strides = array<i32>} : memref<1x128xf32, #tpu.memory_space<vmem>>, vector<1x128xf32>,
    %41 = tpu.iota {dimensions = array<i32: 1>} : vector<1x128xi32>
    %c16_i32 = arith.constant 16 : i32
    %42 = vector.broadcast %c16_i32 : i32 to vector<1x128xi32>
    %43 = arith.cmpi slt, %41, %42 : vector<1x128xi32>
    %c10_i32 = arith.constant 10 : i32
    %44 = vector.broadcast %c10_i32 : i32 to vector<1x128xi32>
    %45 = arith.cmpi slt, %41, %44 : vector<1x128xi32>
    %cst_17 = arith.constant -1.000000e+30 : f32
    %46 = vector.broadcast %cst_17 : f32 to vector<1x128xf32>
    %47 = arith.select %45, %39, %46 : vector<1x128xi1>, vector<1x128xf32>
    %48 = vector.shape_cast %47 : vector<1x128xf32> to vector<1x1x128xf32>
    %cst_18 = arith.constant dense<0xFF800000> : vector<1xf32>
    %49 = vector.multi_reduction <maximumf>, %48, %cst_18 [1, 2] : vector<1x1x128xf32> to vector<1xf32>
    %50 = vector.shape_cast %49 : vector<1xf32> to vector<1x1x1xf32>
    %51 = vector.extract %50[0, 0, 0] : f32 from vector<1x1x1xf32>
    %52 = vector.broadcast %51 : f32 to vector<1x128xf32>
    %53 = arith.cmpf oeq, %47, %52 : vector<1x128xf32>
    %c128_i32 = arith.constant 128 : i32
    %54 = vector.broadcast %c128_i32 : i32 to vector<1x128xi32>
    %55 = arith.select %53, %41, %54 : vector<1x128xi1>, vector<1x128xi32>
    %56 = vector.shape_cast %55 : vector<1x128xi32> to vector<1x1x128xi32>
    %cst_19 = arith.constant dense<2147483647> : vector<1xi32>
    %57 = vector.multi_reduction <minsi>, %56, %cst_19 [1, 2] : vector<1x1x128xi32> to vector<1xi32>
    %58 = vector.shape_cast %57 : vector<1xi32> to vector<1x1x1xi32>
    %59 = vector.extract %58[0, 0, 0] : i32 from vector<1x1x1xi32>
    %c0_20 = arith.constant 0 : index
    %c0_21 = arith.constant 0 : index
    %60 = memref.load %arg6[%c0_20, %c0_21] : memref<1x1xi32, #tpu.memory_space<smem>>
    memref.store %59, %arg6[%c0_20, %c0_21] : memref<1x1xi32, #tpu.memory_space<smem>>
    %61 = vector.broadcast %59 : i32 to vector<1x128xi32>
    %62 = arith.cmpi eq, %41, %61 : vector<1x128xi32>
    %63 = arith.extui %62 : vector<1x128xi1> to vector<1x128xi32>
    %64 = arith.sitofp %63 : vector<1x128xi32> to vector<1x128xf32>
    %65 = vector.broadcast %64 : vector<1x128xf32> to vector<16x128xf32>
    %66 = arith.mulf %28, %65 : vector<16x128xf32>
    %cst_22 = arith.constant dense<0.000000e+00> : vector<16xf32>
    %67 = vector.multi_reduction <add>, %66, %cst_22 [1] : vector<16x128xf32> to vector<16xf32>
    %68 = vector.shape_cast %67 : vector<16xf32> to vector<16x1xf32>
    %cst_23 = arith.constant dense<0.000000e+00> : vector<24x128xf32>
    %69 = tpu.matmul %7, %28, %cst_23 {dimension_numbers = #tpu.dot_dimension_numbers<[1], [0], [0], [1], [0, 0, 1, 1], [], []>} : vector<24x16xf32>, vector<16x128xf32>, vector<24x128xf32> -> vector<24x128xf32>
    %cst_24 = arith.constant dense<0.000000e+00> : vector<24x1xf32>
    %70 = tpu.matmul %8, %68, %cst_24 {dimension_numbers = #tpu.dot_dimension_numbers<[1], [0], [0], [1], [0, 0, 1, 1], [], []>} : vector<24x16xf32>, vector<16x1xf32>, vector<24x1xf32> -> vector<24x1xf32>
    %71 = vector.broadcast %70 : vector<24x1xf32> to vector<24x128xf32>
    %72 = arith.addf %69, %71 : vector<24x128xf32>
    %73 = vector.broadcast %13 : vector<24x1xf32> to vector<24x128xf32>
    %74 = arith.addf %72, %73 : vector<24x128xf32>
    %cst_25 = arith.constant 0.000000e+00 : f32
    %75 = vector.broadcast %cst_25 : f32 to vector<24x128xf32>
    %76 = arith.maximumf %74, %75 : vector<24x128xf32>
    %77 = vector.broadcast %14 : vector<24x1xf32> to vector<24x128xf32>
    %78 = arith.mulf %76, %77 : vector<24x128xf32>
    %cst_26 = arith.constant dense<0.000000e+00> : vector<128xf32>
    %79 = vector.multi_reduction <add>, %78, %cst_26 [0] : vector<24x128xf32> to vector<128xf32>
    %80 = vector.shape_cast %79 : vector<128xf32> to vector<1x128xf32>
    %81 = vector.broadcast %16 : vector<1x1xf32> to vector<1x128xf32>
    %82 = arith.addf %80, %81 : vector<1x128xf32>
    %c0_27 = arith.constant 0 : index
    %c0_28 = arith.constant 0 : index
    %83 = vector.load %arg5[%c0_27, %c0_28] : memref<1x128xf32, #tpu.memory_space<vmem>>, vector<1x128xf32>
    tpu.vector_store %arg5[%c0_27, %c0_28], %82 {strides = array<i32>} : memref<1x128xf32, #tpu.memory_space<vmem>>, vector<1x128xf32>,
    %84 = vector.broadcast %59 : i32 to vector<1x128xi32>
    %85 = arith.cmpi ne, %41, %84 : vector<1x128xi32>
    %86 = arith.andi %43, %85 : vector<1x128xi1>
    %cst_29 = arith.constant -1.000000e+30 : f32
    %87 = vector.broadcast %cst_29 : f32 to vector<1x128xf32>
    %88 = arith.select %86, %82, %87 : vector<1x128xi1>, vector<1x128xf32>
    %89 = vector.shape_cast %88 : vector<1x128xf32> to vector<1x1x128xf32>
    %cst_30 = arith.constant dense<0xFF800000> : vector<1xf32>
    %90 = vector.multi_reduction <maximumf>, %89, %cst_30 [1, 2] : vector<1x1x128xf32> to vector<1xf32>
    %91 = vector.shape_cast %90 : vector<1xf32> to vector<1x1x1xf32>
    %92 = vector.extract %91[0, 0, 0] : f32 from vector<1x1x1xf32>
    %93 = vector.broadcast %92 : f32 to vector<1x128xf32>
    %94 = arith.cmpf oeq, %88, %93 : vector<1x128xf32>
    %c128_i32_31 = arith.constant 128 : i32
    %95 = vector.broadcast %c128_i32_31 : i32 to vector<1x128xi32>
    %96 = arith.select %94, %41, %95 : vector<1x128xi1>, vector<1x128xi32>
    %97 = vector.shape_cast %96 : vector<1x128xi32> to vector<1x1x128xi32>
    %cst_32 = arith.constant dense<2147483647> : vector<1xi32>
    %98 = vector.multi_reduction <minsi>, %97, %cst_32 [1, 2] : vector<1x1x128xi32> to vector<1xi32>
    %99 = vector.shape_cast %98 : vector<1xi32> to vector<1x1x1xi32>
    %100 = vector.extract %99[0, 0, 0] : i32 from vector<1x1x1xi32>
    %c0_33 = arith.constant 0 : index
    %c0_34 = arith.constant 0 : index
    %101 = memref.load %arg7[%c0_33, %c0_34] : memref<1x1xi32, #tpu.memory_space<smem>>
    memref.store %100, %arg7[%c0_33, %c0_34] : memref<1x1xi32, #tpu.memory_space<smem>>
    %102 = vector.broadcast %100 : i32 to vector<1x128xi32>
    %103 = arith.cmpi eq, %41, %102 : vector<1x128xi32>
    %104 = arith.extui %103 : vector<1x128xi1> to vector<1x128xi32>
    %105 = arith.sitofp %104 : vector<1x128xi32> to vector<1x128xf32>
    %cst_35 = arith.constant dense<0.000000e+00> : vector<1x16xf32>
    %106 = tpu.matmul %105, %1, %cst_35 {dimension_numbers = #tpu.dot_dimension_numbers<[1], [1], [0], [0], [0, 0, 1, 0], [], []>} : vector<1x128xf32>, vector<16x128xf32>, vector<1x16xf32> -> vector<1x16xf32>
    %c0_36 = arith.constant 0 : index
    %c0_37 = arith.constant 0 : index
    %107 = vector.load %arg8[%c0_36, %c0_37] : memref<1x16xf32, #tpu.memory_space<vmem>>, vector<1x16xf32>
    tpu.vector_store %arg8[%c0_36, %c0_37], %106 {strides = array<i32>} : memref<1x16xf32, #tpu.memory_space<vmem>>, vector<1x16xf32>,
    return
  }
}

</mosaic_0001>

<bundles_post_ra>
// kernel: xgnn_forward.1
= control target key start
LH: loop header
LB: loop body
LE: loop exit
PB: predicated region body
PF: predicated region fallthrough
CT: control target
= control target key end

     0   :  { %14 = vsyncpa [#allocation3], 0  ;;  %s1583_s0 = inlined_call_operand.vmem [shape: f32[128,128], index: 0, kind: input, shape index: {}]   ;;  %s1584_s1 = inlined_call_operand.vmem [shape: f32[16,128], index: 1, kind: input, shape index: {}]   ;;  %s1585_s2 = inlined_call_operand.vmem [shape: f32[96,16], index: 2, kind: input, shape index: {}]   ;;  %s1586_s3 = inlined_call_operand.vmem [shape: f32[24,8], index: 3, kind: input, shape index: {}]   ;;  %s1587_s4 = inlined_call_operand.vmem [shape: f32[1,128], index: 4, kind: output, shape index: {0}]   ;;  %s1588_s5 = inlined_call_operand.vmem [shape: f32[1,128], index: 5, kind: output, shape index: {1}]   ;;  %s1589_s6 = inlined_call_operand.hbm [shape: s32[1,1], index: 6, kind: output, shape index: {2}]   ;;  %s1590_s7 = inlined_call_operand.hbm [shape: s32[1,1], index: 7, kind: output, shape index: {3}]   ;;  %s1591_s8 = inlined_call_operand.vmem [shape: f32[1,16], index: 8, kind: output, shape index: {4}]  }
   0x1   :  { %v24_v0 = vld [vmem:[%s1583_s0] sm:$0xff]  ;;  %v25_v1 = vld [vmem:[%s1583_s0 + $0x8] sm:$0xff]  ;;  %v26_v2 = vld [vmem:[%s1583_s0 + $0x10] sm:$0xff] }
   0x2   :  { %v1156_v3 = vpack.c.bf16 %v25_v1, %v24_v0  ;;  %v27_v4 = vld [vmem:[%s1583_s0 + $0x18] sm:$0xff]  ;;  %v28_v6 = vld [vmem:[%s1583_s0 + $0x20] sm:$0xff]  ;;  %v29_v7 = vld [vmem:[%s1583_s0 + $0x28] sm:$0xff] }
   0x3   :  { %v1160_v5 = vpack.c.bf16 %v27_v4, %v26_v2  ;;  %v1164_v8 = vpack.c.bf16 %v29_v7, %v28_v6  ;;  %v1379_v9 = vld [vmem:[%s1584_s1] sm:$0xff]  ;;  %v1384_v10 = vld [vmem:[%s1584_s1 + $0x8] sm:$0xff]  ;;  %v30_v11 = vld [vmem:[%s1583_s0 + $0x30] sm:$0xff] }
   0x4   :  { %1157 = vmatprep.subr.bf16.mxu0 %v1156_v3  ;;  %v31_v12 = vld [vmem:[%s1583_s0 + $0x38] sm:$0xff]  ;;  %1064 = vmatprep.mubr.f32.mxu0 %v1379_v9  ;;  %v1239_v13 = vpack.c.bf16 %v1384_v10, %v1379_v9 }
   0x5   :  { %1159 = vmatpush3.bf16.msra.mxu0 %v1156_v3 }
   0x6   :  { %1161 = vmatprep.subr.bf16.mxu0 %v1160_v5 }
   0x7   :  { %15 = vsyncpa [#allocation5], 0  ;;  %v1168_v14 = vpack.c.bf16 %v31_v12, %v30_v11  ;;  %v32_v15 = vld [vmem:[%s1583_s0 + $0x40] sm:$0xff]  ;;  %v33_v16 = vld [vmem:[%s1583_s0 + $0x48] sm:$0xff]  ;;  %vm142_vm0 = vcmask 130048   ;;  %v1300_v29 = vmov 0  }
   0x8   :  { %v1172_v17 = vpack.c.bf16 %v33_v16, %v32_v15  ;;  %v34_v18 = vld [vmem:[%s1583_s0 + $0x50] sm:$0xff]  ;;  %v35_v19 = vld [vmem:[%s1583_s0 + $0x58] sm:$0xff]  ;;  %v36_v21 = vld [vmem:[%s1583_s0 + $0x60] sm:$0xff]  ;;  %1262 = vset.pattern.permute.xlu0 %v1300_v29  ;;  %v1301_v44 = vmov 1   ;;  %v1302_v50 = vmov 0.0|0.0   ;;  %v1303_v51 = vmov 2  }
   0x9   :  { %1163 = vmatpush3.bf16.msra.mxu0 %v1160_v5  ;;  %v1176_v20 = vpack.c.bf16 %v35_v19, %v34_v18  ;;  %v37_v22 = vld [vmem:[%s1583_s0 + $0x68] sm:$0xff]  ;;  %v38_v24 = vld [vmem:[%s1583_s0 + $0x70] sm:$0xff]  ;;  %v39_v25 = vld [vmem:[%s1583_s0 + $0x78] sm:$0xff]  ;;  %1263 = vset.pattern.permute.xlu1 %v1301_v44  ;;  %v1304_v52 = vmov 3   ;;  %v1305_v53 = vmov 6   ;;  %v506_v18 = vlaneseq  ;;  %s1276_s28 = scalar_lea.hbm %s1589_s6, 16 }
   0xa   :  { %1165 = vmatprep.subr.bf16.mxu0 %v1164_v8  ;;  %v1180_v23 = vpack.c.bf16 %v37_v22, %v36_v21  ;;  %v1184_v26 = vpack.c.bf16 %v39_v25, %v38_v24  ;;  %v42_v27 = vld [vmem:[%s1585_s2] sm:$0xff]  ;;  %v1434_v30 = vld [vmem:[%s1586_s3 + $0x8] sm:$0xff]  ;;  %v44_v43 = vld [vmem:[%s1585_s2 + $0x10] sm:$0xff]  ;;  %vm511_vm2 = vcmask 1040384   ;;  %vm1307_vm9 = vmmov 0   ;;  %p1277_p0 = scmp.ne.s32.totalorder %s1589_s6, %s1276_s28  ;;  %p1280_p1 = scmp.lt.u32.totalorder %s1276_s28, %s1589_s6 }
   0xb   :  { %1071 = vmatprep.mubr.msk.f32.mxu1 %vm142_vm0, %v42_v27  ;;  %v1427_v28 = vld [vmem:[%s1586_s3] sm:$0xff]  ;;  %v43_v34 = vld [vmem:[%s1585_s2 + $0x8] sm:$0xff]  ;;  %v45_v48 = vld [vmem:[%s1585_s2 + $0x18] sm:$0xff]  ;;  %v1478_v21 = vand.u32 127, %v506_v18  ;;  %vm802_vm12 = vcmask 1041409  }
   0xc   :  { %134 = vperm.xlu0 %1262, %v1427_v28   ;;  %302 = vperm.xlu1 %1263, %v1427_v28   ;;  %v46_v49 = vld [vmem:[%s1585_s2 + $0x20] sm:$0xff]  ;;  %v47_v63 = vld [vmem:[%s1585_s2 + $0x28] sm:$0xff]  ;;  %p1282_p2 = pnand %p1280_p1, %p1277_p0 }
   0xd   :  { %1167 = vmatpush3.bf16.msra.mxu0 %v1164_v8  ;;  %vm509_vm1 = vcmp.lt.s32.totalorder %v1478_v21, 10  ;;  %vm508_vm11 = vcmp.lt.s32.totalorder %v1478_v21, 16 }
   0xe   :  { %1169 = vmatprep.subr.bf16.mxu0 %v1168_v14 }
  0x10   :  { %139 = vperm.xlu0 %1262, %v1434_v30   ;;  %306 = vperm.xlu1 %1263, %v1434_v30  }
  0x11   :  { %1171 = vmatpush3.bf16.msra.mxu0 %v1168_v14 }
  0x12   :  { %1173 = vmatprep.subr.bf16.mxu0 %v1172_v17 }
  0x14   :  { %1264 = vset.pattern.permute.xlu0 %v1303_v51  ;;  %1265 = vset.pattern.permute.xlu1 %v1303_v51 }
  0x15   :  { %1175 = vmatpush3.bf16.msra.mxu0 %v1172_v17  ;;  %393 = vperm.xlu0 %1264, %v1427_v28  }
  0x16   :  { %1177 = vmatprep.subr.bf16.mxu0 %v1176_v20  ;;  %397 = vperm.xlu1 %1265, %v1434_v30  }
  0x19   :  { %1179 = vmatpush3.bf16.msra.mxu0 %v1176_v20  ;;  %1267 = vset.pattern.permute.xlu0 %v1304_v52 }
  0x1a   :  { %1181 = vmatprep.subr.bf16.mxu0 %v1180_v23  ;;  %1266 = vset.pattern.permute.xlu1 %v1304_v52 }
  0x1b   :  { %488 = vperm.xlu0 %1267, %v1434_v30   ;;  %484 = vperm.xlu1 %1266, %v1427_v28  }
  0x1d   :  { %1183 = vmatpush3.bf16.msra.mxu0 %v1180_v23 }
  0x1e   :  { %1185 = vmatprep.subr.bf16.mxu0 %v1184_v26 }
  0x1f   :  { %1268 = vset.pattern.permute.xlu1 %v1305_v53  ;;  %1270 = vset.pattern.permute.xlu0 %v1300_v29 }
  0x20   :  { %501 = vperm.xlu1 %1268, %v1427_v28  }
  0x21   :  { %1187 = vmatpush3.bf16.msra.mxu0 %v1184_v26 }
  0x24   :  { %1065 = vmatmul.mubr.f32.vlgmr.msra.gmra.mrb[0].mxu0 %v1384_v10  ;;  %1269 = vset.pattern.permute.xlu1 %v1300_v29 }
  0x25   :  { %1113 = vmatprep.mubr.msk.f32.mxu0 %vm142_vm0, %v44_v43 }
  0x8b   :  { %v135_v35 = vpop.permute.xlu0 %134  ;;  %v303_v54 = vpop.permute.xlu1 %302 }
  0x8f   :  { %v140_v36 = vpop.permute.xlu0 %139  ;;  %v307_v55 = vpop.permute.xlu1 %306 }
  0x94   :  { %v394_v0 = vpop.permute.xlu0 %393 }
  0x95   :  { %v398_v1 = vpop.permute.xlu1 %397 }
  0x9a   :  { %v489_v6 = vpop.permute.xlu0 %488 }
  0xf7   :  { %v1066_v31 = vpop.f32.mrb[0].mxu0 }
  0xf8   :  { %v123_v32 = vpop.f32.mrb[1].mxu0 }
  0xf9   :  { %v1188_v33 = vpack.c.bf16 %v1066_v31, %v123_v32 }
  0xfb   :  { %1189 = vmatprep.subr.bf16.mxu1 %v1188_v33 }
  0xfc   :  { %1191 = vmatpush3.bf16.msra.mxu1 %v1188_v33 }
  0xfd   :  { %1193 = vmatprep.subr.bf16.mxu1 %v1156_v3 }
  0xff   :  { %1072 = vmatmul.mubr.msk.f32.vlgmr.msra.gmra.mrb[0].mxu1 %vm142_vm0, %v43_v34 }
 0x100   :  { %1195 = vmatpush3.bf16.msra.mxu1 %v1156_v3 }
 0x101   :  { %1197 = vmatprep.subr.bf16.mxu1 %v1160_v5 }
 0x104   :  { %1199 = vmatpush3.bf16.msra.mxu1 %v1160_v5 }
 0x105   :  { %1201 = vmatprep.subr.bf16.mxu1 %v1164_v8 }
 0x108   :  { %1203 = vmatpush3.bf16.msra.mxu1 %v1164_v8  ;;  %v485_v8 = vpop.permute.xlu1 %484 }
 0x109   :  { %1205 = vmatprep.subr.bf16.mxu1 %v1168_v14 }
 0x10c   :  { %1207 = vmatpush3.bf16.msra.mxu1 %v1168_v14 }
 0x10d   :  { %1209 = vmatprep.subr.bf16.mxu1 %v1172_v17 }
 0x110   :  { %1211 = vmatpush3.bf16.msra.mxu1 %v1172_v17 }
 0x111   :  { %1213 = vmatprep.subr.bf16.mxu1 %v1176_v20 }
 0x114   :  { %1215 = vmatpush3.bf16.msra.mxu1 %v1176_v20 }
 0x115   :  { %1217 = vmatprep.subr.bf16.mxu1 %v1180_v23 }
 0x118   :  { %1219 = vmatpush3.bf16.msra.mxu1 %v1180_v23  ;;  %v1480_v23 = vpop.permute.xlu1 %501 }
 0x119   :  { %1221 = vmatprep.subr.bf16.mxu1 %v1184_v26 }
 0x11c   :  { %1223 = vmatpush3.bf16.msra.mxu1 %v1184_v26 }
 0x11d   :  { %1232 = vmatprep.subr.bf16.mxu1 %v1302_v50 }
 0x1d2   :  { %v1073_v37 = vpop.f32.mrb[0].mxu1 }
 0x1d3   :  { %v221_v38 = vadd.f32 %v1073_v37, %v140_v36  ;;  %v215_v39 = vpop.f32.mrb[1].mxu1 }
 0x1d4   :  { %v216_v40 = vadd.f32 %v215_v39, %v135_v35 }
 0x1d5   :  { %v225_v42 = vmax.f32 %v221_v38, 0.0 }
 0x1d6   :  { %v224_v41 = vmax.f32 %v216_v40, 0.0 }
 0x1d8   :  { %1106 = vmatprep.mubr.f32.mxu1 %v224_v41 }
 0x1d9   :  { %1107 = vmatmul.mubr.f32.vlgmr.msra.gmra.mrb[2].mxu1 %v225_v42 }
 0x2ac   :  { %v1108_v45 = vpop.f32.mrb[2].mxu1 }
 0x2ad   :  { %v292_v46 = vpop.f32.mrb[3].mxu1 }
 0x2ae   :  { %v1224_v47 = vpack.c.bf16 %v1108_v45, %v292_v46 }
 0x2b0   :  { %1225 = vmatprep.subr.bf16.mxu0 %v1224_v47 }
 0x2b1   :  { %1227 = vmatpush3.bf16.msra.mxu0 %v1224_v47 }
 0x2b4   :  { %1114 = vmatmul.mubr.msk.f32.vlgmr.msra.gmra.mrb[2].mxu0 %vm142_vm0, %v45_v48 }
 0x2b5   :  { %1120 = vmatprep.mubr.msk.f32.mxu0 %vm142_vm0, %v46_v49 }
 0x387   :  { %v1115_v56 = vpop.f32.mrb[2].mxu0 }
 0x388   :  { %v1463_v57 = vadd.f32 %v1115_v56, %v307_v55  ;;  %v381_v58 = vpop.f32.mrb[3].mxu0 }
 0x389   :  { %v1465_v59 = vadd.f32 %v381_v58, %v303_v54 }
 0x38a   :  { %v391_v60 = vmax.f32 %v1463_v57, 0.0  ;;  %v49_v57 = vld [vmem:[%s1585_s2 + $0x38] sm:$0xff] }
 0x38b   :  { %v390_v61 = vmax.f32 %v1465_v59, 0.0  ;;  %v50_v59 = vld [vmem:[%s1585_s2 + $0x40] sm:$0xff] }
 0x38d   :  { %v1228_v62 = vpack.c.bf16 %v391_v60, %v390_v61 }
 0x38f   :  { %1229 = vmatprep.subr.bf16.mxu0 %v1228_v62 }
 0x390   :  { %1231 = vmatpush3.bf16.msra.mxu0 %v1228_v62 }
 0x391   :  { %1235 = vmatprep.subr.bf16.mxu0 %v1302_v50 }
 0x393   :  { %1121 = vmatmul.mubr.msk.f32.vlgmr.msra.gmra.mrb[4].mxu0 %vm142_vm0, %v47_v63 }
 0x394   :  { %1237 = vmatpush3.bf16.msra.mxu0 %v1228_v62 }
 0x466   :  { %v1122_v2 = vpop.f32.mrb[4].mxu0 }
 0x467   :  { %v478_v3 = vadd.f32 %v1122_v2, %v398_v1  ;;  %v472_v4 = vpop.f32.mrb[5].mxu0 }
 0x468   :  { %v473_v5 = vadd.f32 %v472_v4, %v394_v0  ;;  %v1306_v0 = vmov 0.0   ;;  %v48_v4 = vld [vmem:[%s1585_s2 + $0x30] sm:$0xff] }
 0x469   :  { %v482_v7 = vmax.f32 %v478_v3, 0.0  ;;  %1127 = vmatprep.mubr.msk.f32.mxu1 %vm1307_vm9, %v1306_v0  ;;  %1140 = vmatprep.mubr.msk.f32.mxu0 %vm1307_vm9, %v1306_v0 }
 0x46a   :  { %v481_v11 = vmax.f32 %v473_v5, 0.0  ;;  %1141 = vmatmul.mubr.msk.f32.vlgmr.msra.gmra.mrb[6].mxu0 %vm142_vm0, %v48_v4 }
 0x46b   :  { %v492_v12 = vmul.f32 %v489_v6, %v482_v7  ;;  %1143 = vmatprep.mubr.msk.f32.mxu0 %vm1307_vm9, %v1306_v0  ;;  %v51_v6 = vld [vmem:[%s1585_s2 + $0x48] sm:$0xff]  ;;  %v52_v7 = vld [vmem:[%s1585_s2 + $0x50] sm:$0xff] }
 0x46c   :  { %v491_v14 = vmul.f32 %v485_v8, %v481_v11  ;;  %v53_v8 = vld [vmem:[%s1585_s2 + $0x58] sm:$0xff] }
 0x46e   :  { %v493_v15 = vadd.f32 %v492_v12, %v491_v14  ;;  %1144 = vmatmul.mubr.msk.f32.gmra.mrb[8].mxu0 %vm142_vm0, %v49_v57 }
 0x46f   :  { %1146 = vmatprep.mubr.msk.f32.mxu0 %vm1307_vm9, %v1306_v0 }
 0x470   :  { %v494_v16 = vrot.slane %v493_v15, 4 }
 0x472   :  { %v495_v17 = vadd.f32 %v494_v16, %v493_v15  ;;  %1147 = vmatmul.mubr.msk.f32.gmra.mrb[10].mxu0 %vm142_vm0, %v50_v59  ;;  %v1308_v16 = vmov 4  }
 0x474   :  { %v496_v19 = vrot.slane %v495_v17, 2 }
 0x476   :  { %v497_v20 = vadd.f32 %v496_v19, %v495_v17 }
 0x478   :  { %v498_v22 = vrot.slane %v497_v20, 1 }
 0x47a   :  { %v499_v24 = vadd.f32 %v498_v22, %v497_v20  ;;  %v56_v20 = vld [vmem:[%s1586_s3 + $0x10] sm:$0xff] }
 0x47c   :  { %v504_v25 = vadd.f32 %v1480_v23, %v499_v24 }
 0x47e   :  { %505 = vst [vmem:[%s1587_s4] sm:$0x1] %v504_v25  ;;  %v510_v26 = vsel %vm509_vm1, %v504_v25, -1e+30 }
 0x47f   :  { %v512_v27 = vsel %vm511_vm2, %v510_v26, -inf }
 0x480   :  { %513 = vmax.xlane.f32.xlu1 %v512_v27 }
 0x50d   :  { %v514_v31 = vpop.xlane.xlu1 %513 }
 0x50e   :  { %v515_v32 = vrot.slane %v514_v31, 4 }
 0x510   :  { %v516_v33 = vmax.f32 %v514_v31, %v515_v32 }
 0x512   :  { %v517_v34 = vrot.slane %v516_v33, 2 }
 0x514   :  { %v518_v35 = vmax.f32 %v516_v33, %v517_v34 }
 0x516   :  { %v519_v36 = vrot.slane %v518_v35, 1 }
 0x518   :  { %v520_v37 = vmax.f32 %v518_v35, %v519_v36 }
 0x51a   :  { %1241 = vpush %v520_v37 }
 0x54b   :  { %s1242_s12 = spop %1241 }
 0x54c   :  { %v522_v38 = vstv %s1242_s12 }
 0x54d   :  { %vm523_vm3 = vcmp.eq.f32.partialorder %v510_v26, %v522_v38 }
 0x54e   :  { %v524_v39 = vsel %vm523_vm3, %v1478_v21, 128 }
 0x54f   :  { %v525_v40 = vsel %vm511_vm2, %v524_v39, 2147483647 }
 0x550   :  { %v527_v41 = vshra.s32 %v525_v40, 16  ;;  %v526_v43 = vand.u32 65535, %v525_v40 }
 0x552   :  { %v529_v42 = vcvt.s32.f32 %v527_v41  ;;  %v528_v45 = vcvt.s32.f32 %v526_v43 }
 0x554   :  { %530 = vmin.xlane.f32.xlu0 %v529_v42 }
 0x5e1   :  { %v531_v44 = vpop.xlane.xlu0 %530 }
 0x5e2   :  { %vm532_vm4 = vcmp.eq.f32.partialorder %v529_v42, %v531_v44  ;;  %v537_v47 = vcvt.f32.s32 %v531_v44 }
 0x5e3   :  { %v533_v46 = vsel %vm532_vm4, %v528_v45, inf }
 0x5e4   :  { %534 = vmin.xlane.f32.xlu0 %v533_v46  ;;  %v538_v49 = vshll.u32 %v537_v47, 16 }
 0x671   :  { %v535_v48 = vpop.xlane.xlu0 %534 }
 0x672   :  { %v536_v51 = vcvt.f32.s32 %v535_v48 }
 0x674   :  { %v539_v52 = vadd.s32 %v538_v49, %v536_v51 }
 0x676   :  { %v540_v53 = vrot.slane %v539_v52, 4 }
 0x678   :  { %vm541_vm5 = vcmp.lt.s32.totalorder %v539_v52, %v540_v53 }
 0x679   :  { %v542_v54 = vsel %vm541_vm5, %v539_v52, %v540_v53 }
 0x67a   :  { %v543_v55 = vrot.slane %v542_v54, 2 }
 0x67c   :  { %vm544_vm6 = vcmp.lt.s32.totalorder %v542_v54, %v543_v55 }
 0x67d   :  { %v545_v56 = vsel %vm544_vm6, %v542_v54, %v543_v55 }
 0x67e   :  { %v546_v58 = vrot.slane %v545_v56, 1 }
 0x680   :  { %vm547_vm7 = vcmp.lt.s32.totalorder %v545_v56, %v546_v58 }
 0x681   :  { %v548_v62 = vsel %vm547_vm7, %v545_v56, %v546_v58 }
 0x682   :  { %1243 = vpush %v548_v62 }
 0x6b3   :  { %s1490_s4 = spop %1243 }
 0x6b4   :  { %v552_v63 = vstv %s1490_s4  ;;  %551 = sst [smem:[#allocation2]] %s1490_s4 }
 0x6b5   :  { %vm553_vm8 = vcmp.eq.s32.totalorder %v1478_v21, %v552_v63  ;;  %vm799_vm10 = vcmp.ne.s32.totalorder %v1478_v21, %v552_v63 }
 0x6b6   :  { %v962_v1 = vsel %vm553_vm8, 1.0, %v1306_v0  ;;  %vm800_vm13 = vmand %vm508_vm11, %vm799_vm10 }
 0x6b7   :  { %v557_v2 = vmul.f32 %v962_v1, %v391_v60  ;;  %v556_v3 = vmul.f32 %v962_v1, %v390_v61 }
 0x6b9   :  { %560 = vadd.xlane.f32.xlu0 %v557_v2  ;;  %558 = vadd.xlane.f32.xlu1 %v556_v3 }
 0x746   :  { %v561_v60 = vpop.xlane.xlu0 %560  ;;  %v559_v61 = vpop.xlane.xlu1 %558 }
 0x747   :  { %v1233_v5 = vpack.c.bf16 %v561_v60, %v559_v61 }
 0x749   :  { %1234 = vmatpush3.bf16.msra.mxu1 %v1233_v5 }
 0x74a   :  { %1238 = vmatprep.subr.bf16.mxu1 %v1302_v50  ;;  %v741_v50 = vpop.f32.mrb[6].mxu0 }
 0x74b   :  { %v1142_v11 = vpop.f32.mrb[7].mxu0 }
 0x74c   :  { %1128 = vmatmul.mubr.msk.f32.vlgmr.msra.gmra.mrb[4].mxu1 %vm142_vm0, %v51_v6  ;;  %v746_v18 = vpop.f32.mrb[8].mxu0 }
 0x74d   :  { %1130 = vmatprep.mubr.msk.f32.mxu1 %vm1307_vm9, %v1306_v0  ;;  %v1145_v9 = vpop.f32.mrb[9].mxu0 }
 0x74e   :  { %v751_v22 = vpop.f32.mrb[10].mxu0 }
 0x74f   :  { %v1148_v24 = vpop.f32.mrb[11].mxu0 }
 0x750   :  { %1131 = vmatmul.mubr.msk.f32.gmra.mrb[6].mxu1 %vm142_vm0, %v52_v7 }
 0x751   :  { %1133 = vmatprep.mubr.msk.f32.mxu1 %vm1307_vm9, %v1306_v0 }
 0x752   :  { %1240 = vmatpush3.bf16.xpose.msra.mxu1 %v1239_v13  ;;  %v1309_v13 = vmov 5  }
 0x754   :  { %1134 = vmatmul.mubr.msk.f32.gmra.mrb[8].mxu1 %vm142_vm0, %v53_v8 }
 0x755   :  { %1153 = vmatprep.mubr.msk.f32.mxu1 %vm1307_vm9, %v1306_v0 }
 0x81f   :  { %v637_v12 = vpop.f32.mrb[4].mxu1 }
 0x820   :  { %653 = vperm.xlu1 %1269, %v637_v12   ;;  %v1129_v14 = vpop.f32.mrb[5].mxu1 }
 0x823   :  { %v642_v15 = vpop.f32.mrb[6].mxu1 }
 0x824   :  { %1271 = vset.pattern.permute.xlu1 %v1308_v16  ;;  %658 = vperm.xlu0 %1270, %v642_v15   ;;  %v1132_v17 = vpop.f32.mrb[7].mxu1 }
 0x825   :  { %756 = vperm.xlu1 %1271, %v1427_v28  }
 0x827   :  { %v647_v19 = vpop.f32.mrb[8].mxu1 }
 0x828   :  { %v1135_v10 = vpop.f32.mrb[9].mxu1  ;;  %1275 = vset.pattern.permute.xlu0 %v1309_v13 }
 0x829   :  { %760 = vperm.xlu1 %1271, %v1434_v30  }
 0x82d   :  { %765 = vperm.xlu1 %1271, %v56_v20  }
 0x831   :  { %1272 = vset.pattern.permute.xlu1 %v1309_v13 }
 0x832   :  { %775 = vperm.xlu1 %1272, %v1427_v28  }
 0x836   :  { %1273 = vset.pattern.permute.xlu1 %v1300_v29 }
 0x837   :  { %663 = vperm.xlu1 %1273, %v647_v19  }
 0x83b   :  { %1274 = vset.pattern.permute.xlu1 %v1309_v13 }
 0x83c   :  { %779 = vperm.xlu1 %1274, %v1434_v30  }
 0x840   :  { %783 = vperm.xlu1 %1274, %v56_v20   ;;  %v1310_v20 = vmov 1.0  }
 0x89f   :  { %v654_v25 = vpop.permute.xlu1 %653 }
 0x8a0   :  { %v742_v35 = vadd.f32 %v741_v50, %v654_v25 }
 0x8a3   :  { %v659_v32 = vpop.permute.xlu0 %658 }
 0x8a4   :  { %v757_v26 = vpop.permute.xlu1 %756  ;;  %v747_v34 = vadd.f32 %v746_v18, %v659_v32 }
 0x8a5   :  { %v768_v36 = vadd.f32 %v757_v26, %v742_v35 }
 0x8a7   :  { %v771_v39 = vmax.f32 %v768_v36, 0.0 }
 0x8a8   :  { %v761_v27 = vpop.permute.xlu1 %760 }
 0x8a9   :  { %v769_v37 = vadd.f32 %v761_v27, %v747_v34 }
 0x8ab   :  { %v772_v29 = vmax.f32 %v769_v37, 0.0 }
 0x8ac   :  { %v766_v31 = vpop.permute.xlu1 %765 }
 0x8b1   :  { %v776_v33 = vpop.permute.xlu1 %775 }
 0x8b2   :  { %v786_v42 = vmul.f32 %v776_v33, %v771_v39 }
 0x8b6   :  { %v664_v28 = vpop.permute.xlu1 %663 }
 0x8b7   :  { %v752_v38 = vadd.f32 %v751_v22, %v664_v28 }
 0x8b9   :  { %v770_v40 = vadd.f32 %v766_v31, %v752_v38 }
 0x8bb   :  { %v780_v41 = vpop.permute.xlu1 %779  ;;  %v773_v44 = vmax.f32 %v770_v40, 0.0 }
 0x8bc   :  { %v787_v30 = vmul.f32 %v780_v41, %v772_v29 }
 0x8be   :  { %v789_v43 = vadd.f32 %v787_v30, %v786_v42 }
 0x8bf   :  { %v784_v45 = vpop.permute.xlu1 %783 }
 0x8c0   :  { %v788_v46 = vmul.f32 %v784_v45, %v773_v44 }
 0x8c2   :  { %v790_v47 = vadd.f32 %v789_v43, %v788_v46 }
 0x8c4   :  { %v791_v48 = vrot.slane %v790_v47, 4 }
 0x8c6   :  { %v792_v49 = vadd.f32 %v791_v48, %v790_v47 }
 0x8c8   :  { %v793_v51 = vrot.slane %v792_v49, 2 }
 0x8ca   :  { %v794_v52 = vadd.f32 %v793_v51, %v792_v49 }
 0x8cc   :  { %v795_v53 = vrot.slane %v794_v52, 1 }
 0x8ce   :  { %v796_v54 = vadd.f32 %v795_v53, %v794_v52 }
 0x8d0   :  { %v797_v55 = vadd.f32 %v796_v54, %v1480_v23 }
 0x8d2   :  { %v801_v56 = vsel %vm800_vm13, %v797_v55, -1e+30  ;;  %798 = vst [vmem:[%s1588_s5 - $0x1] sm:$0x2] %v797_v55 }
 0x8d3   :  { %v803_v58 = vsel %vm802_vm12, %v801_v56, -inf }
 0x8d4   :  { %804 = vmax.xlane.f32.xlu1 %v803_v58 }
 0x961   :  { %v805_v62 = vpop.xlane.xlu1 %804 }
 0x962   :  { %v806_v0 = vrot.slane %v805_v62, 4 }
 0x964   :  { %v807_v1 = vmax.f32 %v805_v62, %v806_v0 }
 0x966   :  { %v808_v2 = vrot.slane %v807_v1, 2 }
 0x968   :  { %v809_v63 = vmax.f32 %v807_v1, %v808_v2 }
 0x96a   :  { %v810_v3 = vrot.slane %v809_v63, 1 }
 0x96c   :  { %v811_v4 = vmax.f32 %v809_v63, %v810_v3 }
 0x96e   :  { %1245 = vpush %v811_v4 }
 0x99f   :  { %s1246_s1 = spop %1245 }
 0x9a0   :  { %v813_v23 = vstv %s1246_s1 }
 0x9a1   :  { %vm814_vm14 = vcmp.eq.f32.partialorder %v801_v56, %v813_v23 }
 0x9a2   :  { %v815_v57 = vsel %vm814_vm14, %v1478_v21, 128 }
 0x9a3   :  { %v816_v59 = vsel %vm802_vm12, %v815_v57, 2147483647 }
 0x9a4   :  { %v818_v60 = vshra.s32 %v816_v59, 16  ;;  %v817_v5 = vand.u32 65535, %v816_v59 }
 0x9a6   :  { %v820_v61 = vcvt.s32.f32 %v818_v60  ;;  %v819_v7 = vcvt.s32.f32 %v817_v5 }
 0x9a8   :  { %821 = vmin.xlane.f32.xlu0 %v820_v61 }
 0xa35   :  { %v822_v6 = vpop.xlane.xlu0 %821 }
 0xa36   :  { %vm823_vm15 = vcmp.eq.f32.partialorder %v820_v61, %v822_v6  ;;  %v828_v50 = vcvt.f32.s32 %v822_v6 }
 0xa37   :  { %v824_v8 = vsel %vm823_vm15, %v819_v7, inf }
 0xa38   :  { %825 = vmin.xlane.f32.xlu0 %v824_v8  ;;  %v829_v12 = vshll.u32 %v828_v50, 16 }
 0xac5   :  { %v826_v11 = vpop.xlane.xlu0 %825 }
 0xac6   :  { %v827_v14 = vcvt.f32.s32 %v826_v11 }
 0xac8   :  { %v830_v15 = vadd.s32 %v829_v12, %v827_v14 }
 0xaca   :  { %v831_v16 = vrot.slane %v830_v15, 4 }
 0xacc   :  { %vm832_vm0 = vcmp.lt.s32.totalorder %v830_v15, %v831_v16 }
 0xacd   :  { %v833_v17 = vsel %vm832_vm0, %v830_v15, %v831_v16 }
 0xace   :  { %v834_v18 = vrot.slane %v833_v17, 2 }
 0xad0   :  { %vm835_vm1 = vcmp.lt.s32.totalorder %v833_v17, %v834_v18 }
 0xad1   :  { %v836_v19 = vsel %vm835_vm1, %v833_v17, %v834_v18 }
 0xad2   :  { %v837_v9 = vrot.slane %v836_v19, 1 }
 0xad4   :  { %vm838_vm2 = vcmp.lt.s32.totalorder %v836_v19, %v837_v9 }
 0xad5   :  { %v839_v10 = vsel %vm838_vm2, %v836_v19, %v837_v9 }
 0xad6   :  { %1247 = vpush %v839_v10 }
 0xb07   :  { %s1248_s5 = spop %1247 }
 0xb08   :  { %842 = sst [smem:[#allocation4]] %s1248_s5  ;;  %v843_v13 = vstv %s1248_s5 }
 0xb09   :  { %vm844_vm3 = vcmp.eq.s32.totalorder %v1478_v21, %v843_v13 }
 0xb0a   :  { %1154 = vmatmul.mubr.msk.f32.vlgmr.msra.gmra.mrb[10].mxu1 %vm844_vm3, %v1310_v20 }
 0xb0b   :  { %1285 = shalt.err (!%p1282_p2)
}
 0xb0c   :  { %s1311_s11 = smov [#allocation2]   ;;  %s1286_s15 = scalar_lea.hbm %s1590_s7, 16 }
 0xb0d   :  { %930 = dma.smem_to_hbm %s1311_s11, 16, %s1589_s6, [#allocation3]  }
 0xb0e   :  { %p1287_p3 = scmp.ne.s32.totalorder %s1590_s7, %s1286_s15  ;;  %p1290_p4 = scmp.lt.u32.totalorder %s1286_s15, %s1590_s7 }
 0xb10   :  { %p1292_p5 = pnand %p1290_p4, %p1287_p3 }
 0xb12   :  { %1295 = shalt.err (!%p1292_p5)
}
 0xb13   :  { %s1312_s20 = smov [#allocation4]   ;;  %vm917_vm4 = vcmask 122880  }
 0xb14   :  { %938 = dma.smem_to_hbm %s1312_s20, 16, %s1590_s7, [#allocation5]  }
 0xbdd   :  { %v913_v21 = vpop.f32.mrb[10].mxu1 }
 0xbde   :  { %918 = vst.msk [vmem:[%s1591_s8] sm:$0x1] %vm917_vm4, %v913_v21  ;;  %v1155_v22 = vpop.f32.mrb[11].mxu1 }
 0xbdf   :  { %1296 = dma.done.wait [#allocation3], 16  }
 0xbe0   :  { %1297 = vsyncadd [#allocation3], 4294967280 }
 0xbe1   :  { %1298 = dma.done.wait [#allocation5], 16  }
 0xbe2   :  { %1299 = vsyncadd [#allocation5], 4294967280 }
 0xbe3   :  { %953 = sfence }
 0xbe4   :  { %954 = vsyncpa [#allocation3], 1 }
 0xbe5   :  { %955 = vsyncpa [#allocation5], 1 }

</bundles_post_ra>
